<compile_context>
chip_gen: v5e
topology: v5e:2x2
jax: 0.10.0
libtpu: 0.0.40
codegen_flags: <defaults>
</compile_context>

<pallas_src>
import jax
import jax.numpy as jnp
from jax import lax
from jax.experimental import pallas as pl
from jax.experimental.pallas import tpu as pltpu


_HEADROOM = 2 << 20            # slack for compiler-internal temps
_DEFAULT_SCOPED = 16 << 20     # smallest default scoped-VMEM limit (v5e)


def _vmem_budget_bytes():
    """Usable scoped-VMEM budget for this kernel, per TPU generation."""
    try:
        cap = int(pltpu.get_tpu_info().vmem_capacity_bytes)
    except Exception:
        cap = 64 << 20         # be conservative: assume the smallest (v7x)
    return (3 * cap) // 4      # ~48 MiB on v7x, ~96 MiB on v5e/v6e


# ---------------------------------------------------------------------------
# Fused path: one (TB, C, L) slab per grid step.
# ---------------------------------------------------------------------------
def _fused_kernel(x_ref, w1_ref, w2_ref, o_ref):
    x = x_ref[...]                                        # (TB, C, L) native dtype
    # Squeeze: f32-accumulated mean over L (the lane axis).
    y = jnp.mean(x, axis=-1, dtype=jnp.float32)           # (TB, C)
    # Excite: y @ W1.T -> ReLU -> @ W2.T -> sigmoid.  Contracting dim 1 of
    # both operands right-multiplies by W.T directly in the PyTorch layout.
    h = lax.dot_general(y, w1_ref[...], (((1,), (1,)), ((), ())),
                        preferred_element_type=jnp.float32)          # (TB, C//r)
    h = jnp.maximum(h, 0.0)
    s = lax.dot_general(h, w2_ref[...], (((1,), (1,)), ((), ())),
                        preferred_element_type=jnp.float32)          # (TB, C)
    gate = jax.nn.sigmoid(s).astype(x.dtype)
    # Scale: broadcast the per-(row, channel) gate over L, native dtype.
    o_ref[...] = x * gate[:, :, None]


def _call_fused(x, w1f, w2f, tb, budget):
    b, c, l = x.shape
    cr = w1f.shape[0]
    itemsize = x.dtype.itemsize
    nb = b // tb

    in_blk = tb * c * l * itemsize
    f32_temp = tb * c * l * 4 if itemsize < 4 else 0
    w_bytes = 2 * 4 * (w1f.size + w2f.size)
    need = 4 * in_blk + f32_temp + w_bytes + _HEADROOM     # 2x in + 2x out

    # v5e/v6e (128 MiB VMEM): a third input buffer hides DMA issue latency on
    # longer grids; skip on v7x where it would eat into the 64 MiB budget.
    use_buf3 = budget >= (72 << 20) and nb >= 3 and (need + in_blk) <= budget
    if use_buf3:
        need += in_blk
        x_spec = pl.BlockSpec((tb, c, l), lambda i: (i, 0, 0),
                              pipeline_mode=pl.Buffered(3))
    else:
        x_spec = pl.BlockSpec((tb, c, l), lambda i: (i, 0, 0))

    vmem_limit = int(budget) if need > _DEFAULT_SCOPED else None

    return pl.pallas_call(
        _fused_kernel,
        out_shape=jax.ShapeDtypeStruct((b, c, l), x.dtype),
        grid=(nb,),
        in_specs=[
            x_spec,
            pl.BlockSpec((cr, c), lambda i: (0, 0)),       # grid-invariant weights
            pl.BlockSpec((c, cr), lambda i: (0, 0)),
        ],
        out_specs=pl.BlockSpec((tb, c, l), lambda i: (i, 0, 0)),
        compiler_params=pltpu.CompilerParams(
            dimension_semantics=("parallel",),
            vmem_limit_bytes=vmem_limit),
    )(x, w1f, w2f)


# ---------------------------------------------------------------------------
# Tiled two-phase path: squeeze pass then scale pass over C tiles.
# ---------------------------------------------------------------------------
def _tiled_kernel(x_ref, w1_ref, w2_ref, o_ref, sums_ref, gate_ref):
    # x_ref / o_ref: (TC, L) tile of one batch row (batch dim squeezed away).
    ph = pl.program_id(1)
    ci = pl.program_id(2)
    tc = x_ref.shape[0]
    row0 = pl.multiple_of(ci * tc, 8)

    @pl.when(ph == 0)
    def _squeeze():
        part = jnp.mean(x_ref[...], axis=-1, keepdims=True,
                        dtype=jnp.float32)                 # (TC, 1)
        sums_ref[pl.ds(row0, tc), :] = part

    @pl.when((ph == 1) & (ci == 0))
    def _excite():
        y = sums_ref[...]                                  # (C, 1) f32 channel means
        h = jnp.maximum(
            lax.dot_general(w1_ref[...], y, (((1,), (0,)), ((), ())),
                            preferred_element_type=jnp.float32), 0.0)   # (C//r, 1)
        s = lax.dot_general(w2_ref[...], h, (((1,), (0,)), ((), ())),
                            preferred_element_type=jnp.float32)         # (C, 1)
        gate_ref[...] = jax.nn.sigmoid(s)

    @pl.when(ph == 1)
    def _scale():
        g = gate_ref[pl.ds(row0, tc), :].astype(o_ref.dtype)            # (TC, 1)
        o_ref[...] = x_ref[...] * g


def _call_tiled(x, w1f, w2f, tc, budget):
    b, c, l = x.shape
    cr = w1f.shape[0]
    itemsize = x.dtype.itemsize
    n_ct = c // tc

    tile = tc * l * itemsize
    f32_temp = tc * l * 4 if itemsize < 4 else 0
    w_bytes = 2 * 4 * (w1f.size + w2f.size)
    need = 4 * tile + f32_temp + w_bytes + 8 * c + _HEADROOM
    vmem_limit = int(budget) if need > _DEFAULT_SCOPED else None

    return pl.pallas_call(
        _tiled_kernel,
        out_shape=jax.ShapeDtypeStruct((b, c, l), x.dtype),
        grid=(b, 2, n_ct),
        in_specs=[
            pl.BlockSpec((None, tc, l), lambda bi, ph, ci: (bi, ci, 0)),
            pl.BlockSpec((cr, c), lambda bi, ph, ci: (0, 0)),
            pl.BlockSpec((c, cr), lambda bi, ph, ci: (0, 0)),
        ],
        # Park the out window on c-block 0 during phase 0 (never written), so
        # each output block is DMA'd back to HBM exactly once after phase 1.
        out_specs=pl.BlockSpec((None, tc, l), lambda bi, ph, ci: (bi, ph * ci, 0)),
        scratch_shapes=[
            pltpu.VMEM((c, 1), jnp.float32),   # per-channel means
            pltpu.VMEM((c, 1), jnp.float32),   # sigmoid gate
        ],
        compiler_params=pltpu.CompilerParams(
            dimension_semantics=("parallel", "arbitrary", "arbitrary"),
            vmem_limit_bytes=vmem_limit),
    )(x, w1f, w2f)


# ---------------------------------------------------------------------------
# Public entry point.
# ---------------------------------------------------------------------------
def se_layer(x, w1, w2, *, force_tiled=False, tile_c=None):
    """SELayer forward.

    x:  (B, C, L) activations (any float dtype; kept native end-to-end)
    w1: (C//r, C) first nn.Linear weight (bias=False), PyTorch layout
    w2: (C, C//r) second nn.Linear weight (bias=False), PyTorch layout
    force_tiled / tile_c are testing/override knobs for the two-phase path.
    """
    b, c, l = x.shape
    cr, c_in = w1.shape
    assert c_in == c and w2.shape == (c, cr), "weights must be nn.Linear layouts"

    # One-time tiny cast so the excite matmuls run in f32 without a per-step
    # in-kernel VPU cast of the VMEM-resident weights.
    w1f = w1.astype(jnp.float32)
    w2f = w2.astype(jnp.float32)

    itemsize = x.dtype.itemsize
    budget = _vmem_budget_bytes()
    w_bytes = 2 * 4 * (w1f.size + w2f.size)

    # Per batch-row cost of the fused path: 2x in + 2x out buffers plus the
    # f32 reduce temp the mean may materialize for sub-f32 inputs.
    row_cost = 4 * c * l * itemsize + (c * l * 4 if itemsize < 4 else 0)
    fixed = w_bytes + _HEADROOM

    if not force_tiled:
        fits = [d for d in range(1, b + 1)
                if b % d == 0 and fixed + d * row_cost <= budget]
        if fits:
            multi = [d for d in fits if b // d >= 2]
            if multi:
                even = [d for d in multi if (b // d) % 2 == 0]
                tb = max(even) if even else max(multi)
            else:
                tb = max(fits)     # b == 1
            return _call_fused(x, w1f, w2f, tb, budget)

    # Tiled two-phase fallback (or forced for testing).
    fixed_t = w_bytes + 8 * c + _HEADROOM
    if tile_c is not None:
        tc = int(tile_c)
        assert c % tc == 0 and tc % 8 == 0, "tile_c must divide C, multiple of 8"
    else:
        per_row = 4 * l * itemsize + (l * 4 if itemsize < 4 else 0)
        cands = [d for d in range(8, c + 1)
                 if c % d == 0 and d % 8 == 0 and fixed_t + d * per_row <= budget]
        tc = max(cands) if cands else None
    if tc is None:
        # C has no multiple-of-8 divisor that fits: run the slab path with the
        # raised limit anyway.
        # TODO(synk): add an L-tiled squeeze for huge slabs with untileable C.
        return _call_fused(x, w1f, w2f, 1, budget)
    return _call_tiled(x, w1f, w2f, tc, budget)


# ---------------------------------------------------------------------------
# Pure-JAX reference + self-test.
# ---------------------------------------------------------------------------
def _reference(x, w1, w2):
    xf = x.astype(jnp.float32)
    y = jnp.mean(xf, axis=-1)                                   # (B, C)
    h = jnp.maximum(y @ w1.astype(jnp.float32).T, 0.0)          # (B, C//r)
    g = jax.nn.sigmoid(h @ w2.astype(jnp.float32).T)            # (B, C)
    return xf * g[:, :, None]


def _make_inputs(key, b, c, l, reduction, dtype):
    cr = max(1, c // reduction)
    kx, k1, k2 = jax.random.split(key, 3)
    x = jax.random.normal(kx, (b, c, l), dtype=jnp.float32).astype(dtype)
    w1 = jax.random.normal(k1, (cr, c), dtype=jnp.float32) / (c ** 0.5)
    w2 = jax.random.normal(k2, (c, cr), dtype=jnp.float32) / (cr ** 0.5)
    return x, w1, w2


if __name__ == "__main__":
    root = jax.random.PRNGKey(0)
    k1, k2, k3 = jax.random.split(root, 3)

    # 1) Fused path, f32 and bf16 (B=2, C=32, L=16, reduction=16).
    x, w1, w2 = _make_inputs(k1, 2, 32, 16, 16, jnp.float32)
    out = se_layer(x, w1, w2)
    jax.block_until_ready(out)
    ref = _reference(x, w1, w2)
    assert out.shape == x.shape and out.dtype == x.dtype
    assert jnp.allclose(out, ref, atol=1e-4, rtol=1e-4)

    xb = x.astype(jnp.bfloat16)
    out_b = se_layer(xb, w1, w2)
    jax.block_until_ready(out_b)
    ref_b = _reference(xb, w1, w2)
    assert out_b.dtype == jnp.bfloat16 and out_b.shape == xb.shape
    assert jnp.allclose(out_b.astype(jnp.float32), ref_b, atol=5e-2, rtol=5e-2)

    # 2) Fused path with TB > 1 (B=8 folds to (4, C, L) blocks, 2 grid steps).
    x2, w12, w22 = _make_inputs(k2, 8, 32, 128, 16, jnp.float32)
    out2 = se_layer(x2, w12, w22)
    jax.block_until_ready(out2)
    assert jnp.allclose(out2, _reference(x2, w12, w22), atol=1e-4, rtol=1e-4)

    # 3) Tiled two-phase path, forced with small C tiles (C=64 -> 4 tiles of 16).
    x3, w13, w23 = _make_inputs(k3, 2, 64, 128, 8, jnp.float32)
    out3 = se_layer(x3, w13, w23, force_tiled=True, tile_c=16)
    jax.block_until_ready(out3)
    assert jnp.allclose(out3, _reference(x3, w13, w23), atol=1e-4, rtol=1e-4)

    x3b = x3.astype(jnp.bfloat16)
    out3b = se_layer(x3b, w13, w23, force_tiled=True, tile_c=16)
    jax.block_until_ready(out3b)
    assert jnp.allclose(out3b.astype(jnp.float32), _reference(x3b, w13, w23),
                        atol=5e-2, rtol=5e-2)

    print("KERNEL_OK")
</pallas_src>

<mosaic_0001>
module attributes {stable_mosaic.version = 11 : i64} {
  func.func @_fused_kernel(%arg0: i32, %arg1: memref<1x32x16xf32, #tpu.memory_space<vmem>>, %arg2: memref<2x32xf32, #tpu.memory_space<vmem>>, %arg3: memref<32x2xf32, #tpu.memory_space<vmem>>, %arg4: memref<1x32x16xf32, #tpu.memory_space<vmem>>) attributes {dimension_semantics = [#tpu.dimension_semantics<parallel>], iteration_bounds = array<i64: 2>, scalar_prefetch = 0 : i64, scratch_operands = 0 : i64, tpu.core_type = #tpu.core_type<tc>, window_params = [{transform_indices = @transform_0, window_bounds = array<i64: 1, 32, 16>}, {pipeline_mode = #tpu.pipeline_mode<synchronous>, transform_indices = @transform_1, window_bounds = array<i64: 2, 32>}, {pipeline_mode = #tpu.pipeline_mode<synchronous>, transform_indices = @transform_2, window_bounds = array<i64: 32, 2>}, {transform_indices = @transform_3, window_bounds = array<i64: 1, 32, 16>}]} {
    %c0 = arith.constant 0 : index
    %c0_0 = arith.constant 0 : index
    %c0_1 = arith.constant 0 : index
    %0 = vector.load %arg1[%c0, %c0_0, %c0_1] : memref<1x32x16xf32, #tpu.memory_space<vmem>>, vector<1x32x16xf32>
    %cst = arith.constant dense<0.000000e+00> : vector<1x32xf32>
    %1 = vector.multi_reduction <add>, %0, %cst [2] : vector<1x32x16xf32> to vector<1x32xf32>
    %cst_2 = arith.constant 1.600000e+01 : f32
    %2 = vector.broadcast %cst_2 : f32 to vector<1x32xf32>
    %3 = arith.divf %1, %2 : vector<1x32xf32>
    %c0_3 = arith.constant 0 : index
    %c0_4 = arith.constant 0 : index
    %4 = vector.load %arg2[%c0_3, %c0_4] : memref<2x32xf32, #tpu.memory_space<vmem>>, vector<2x32xf32>
    %cst_5 = arith.constant dense<0.000000e+00> : vector<1x2xf32>
    %5 = tpu.matmul %3, %4, %cst_5 {dimension_numbers = #tpu.dot_dimension_numbers<[1], [1], [0], [0], [0, 0, 1, 0], [], []>} : vector<1x32xf32>, vector<2x32xf32>, vector<1x2xf32> -> vector<1x2xf32>
    %cst_6 = arith.constant 0.000000e+00 : f32
    %6 = vector.broadcast %cst_6 : f32 to vector<1x2xf32>
    %7 = arith.maximumf %5, %6 : vector<1x2xf32>
    %c0_7 = arith.constant 0 : index
    %c0_8 = arith.constant 0 : index
    %8 = vector.load %arg3[%c0_7, %c0_8] : memref<32x2xf32, #tpu.memory_space<vmem>>, vector<32x2xf32>
    %cst_9 = arith.constant dense<0.000000e+00> : vector<1x32xf32>
    %9 = tpu.matmul %7, %8, %cst_9 {dimension_numbers = #tpu.dot_dimension_numbers<[1], [1], [0], [0], [0, 0, 1, 0], [], []>} : vector<1x2xf32>, vector<32x2xf32>, vector<1x32xf32> -> vector<1x32xf32>
    %10 = arith.negf %9 : vector<1x32xf32>
    %11 = math.exp %10 : vector<1x32xf32>
    %cst_10 = arith.constant 1.000000e+00 : f32
    %12 = vector.broadcast %cst_10 : f32 to vector<1x32xf32>
    %13 = arith.addf %12, %11 : vector<1x32xf32>
    %14 = arith.divf %12, %13 : vector<1x32xf32>
    %15 = vector.shape_cast %14 : vector<1x32xf32> to vector<1x32x1xf32>
    %16 = vector.broadcast %15 : vector<1x32x1xf32> to vector<1x32x16xf32>
    %17 = arith.mulf %0, %16 : vector<1x32x16xf32>
    %c0_11 = arith.constant 0 : index
    %c0_12 = arith.constant 0 : index
    %c0_13 = arith.constant 0 : index
    %18 = vector.load %arg4[%c0_11, %c0_12, %c0_13] : memref<1x32x16xf32, #tpu.memory_space<vmem>>, vector<1x32x16xf32>
    tpu.vector_store %arg4[%c0_11, %c0_12, %c0_13], %17 {strides = array<i32>} : memref<1x32x16xf32, #tpu.memory_space<vmem>>, vector<1x32x16xf32>,
    return
  }
  func.func @transform_0(%arg0: i32) -> (i32, i32, i32) {
    %c0_i32 = arith.constant 0 : i32
    %c0_i32_0 = arith.constant 0 : i32
    %c0_i32_1 = arith.constant 0 : i32
    return %arg0, %c0_i32, %c0_i32_0 : i32, i32, i32
  }
  func.func @transform_1(%arg0: i32) -> (i32, i32) {
    %c0_i32 = arith.constant 0 : i32
    %c0_i32_0 = arith.constant 0 : i32
    %c0_i32_1 = arith.constant 0 : i32
    return %c0_i32, %c0_i32_0 : i32, i32
  }
  func.func @transform_2(%arg0: i32) -> (i32, i32) {
    %c0_i32 = arith.constant 0 : i32
    %c0_i32_0 = arith.constant 0 : i32
    %c0_i32_1 = arith.constant 0 : i32
    return %c0_i32, %c0_i32_0 : i32, i32
  }
  func.func @transform_3(%arg0: i32) -> (i32, i32, i32) {
    %c0_i32 = arith.constant 0 : i32
    %c0_i32_0 = arith.constant 0 : i32
    %c0_i32_1 = arith.constant 0 : i32
    return %arg0, %c0_i32, %c0_i32_0 : i32, i32, i32
  }
}

</mosaic_0001>

<bundles_post_ra>
// kernel: tpu_custom_call.1
= control target key start
LH: loop header
LB: loop body
LE: loop exit
PB: predicated region body
PF: predicated region fallthrough
CT: control target
= control target key end

     0   :  { %s463_s12 = smov 0   ;;  %s533_s0 = inlined_call_operand.vmem [shape: f32[2,32,16], index: 0, kind: input, shape index: {}]   ;;  %s534_s1 = inlined_call_operand.vmem [shape: f32[2,32], index: 1, kind: input, shape index: {}]   ;;  %s535_s2 = inlined_call_operand.vmem [shape: f32[32,2], index: 2, kind: input, shape index: {}]   ;;  %s536_s3 = inlined_call_operand.vmem [shape: f32[2,32,16], index: 3, kind: output, shape index: {}]  }
   0x1 LB: > { %s393_s13 = sadd.s32 4294967295, %s440_s12   ;;  %p397_p0 = scmp.ge.s32.totalorder %s440_s12, 1  ;;  %s440_s12 = sphi %s463_s12, %s13_s12  }
   0x2   : > { %p137_p1 = scmp.lt.s32.totalorder %s440_s12, 3 }
   0x4   : > { %p138_p2 = pnand %p397_p0, %p137_p1 }
   0x5   : > { %p161_p3 = scmp.lt.s32.totalorder (!%p138_p2), %s393_s13, 1 }
   0x6   : > { %141 = sbr.rel (%p138_p2) target bundleno = 550 (0x226), region = 32 }
   0xb   : > { %s538_s13 = smov (!%p161_p3, %s393_s13), 1  ;;  %vm175_vm0 = vcmask 130048   ;;  %v442_v8 = vmov 16.0   ;;  %v199_v9 = vld [vmem:[%s534_s1] sm:$0x3]  ;;  %vm219_vm1 = vcmask 261120   ;;  %v204_v18 = vlaneseq }
   0xc   : > { %s412_s14 = sshll.u32 %s538_s13, 5  ;;  %428 = vrcp.f32 %v442_v8  ;;  %402 = vmatpush.xpose.msk.msra.mxu0 %vm219_vm1, %v199_v9  ;;  %v249_v10 = vld [vmem:[%s535_s2 + $0x18] sm:$0xff]  ;;  %vm250_vm2 = vcmask 15360   ;;  %v248_v12 = vld [vmem:[%s535_s2 + $0x10] sm:$0xff]  ;;  %v247_v14 = vld [vmem:[%s535_s2 + $0x8] sm:$0xff]  ;;  %vm209_vm4 = vcmask 130112  }
   0xd   : > { %s165_s17 = scalar_lea.vmem %s533_s0, %s412_s14  ;;  %404 = vmatpush.xpose.msk.msra.mxu1 %vm250_vm2, %v249_v10  ;;  %v205_v22 = vand.u32 127, %v204_v18  ;;  %vm213_vm5 = vcmask 195712   ;;  %vm217_vm6 = vcmask 261312   ;;  %v246_v39 = vld [vmem:[%s535_s2] sm:$0xff]  ;;  %v307_v42 = vshrl.u32 %v204_v18, 7  ;;  %s170_s30 = scalar_lea.vmem %s536_s3, %s412_s14 }
   0xe   : > { %v479_v0 = vld [vmem:[%s165_s17] sm:$0xff]  ;;  %v481_v1 = vld [vmem:[%s165_s17 + $0x10] sm:$0xff]  ;;  %v487_v4 = vld [vmem:[%s165_s17 + $0x8] sm:$0xff] }
   0xf   : > { %v176_v2 = vsel %vm175_vm0, %v479_v0, 0.0  ;;  %v182_v3 = vsel %vm175_vm0, %v481_v1, 0.0  ;;  %v489_v5 = vld [vmem:[%s165_s17 + $0x18] sm:$0xff]  ;;  %v179_v6 = vsel %vm175_vm0, %v487_v4, 0.0  ;;  %v207_v24 = vadd.s32 4294967288, %v205_v22  ;;  %423 = vset.pattern.permute.xlu2 %v307_v42 }
  0x10   : > { %177 = vadd.xlane.f32.xlu0 %v176_v2  ;;  %183 = vadd.xlane.f32.xlu1 %v182_v3  ;;  %v185_v7 = vsel %vm175_vm0, %v489_v5, 0.0  ;;  %v215_v25 = vadd.s32 4294967272, %v205_v22  ;;  %v211_v26 = vadd.s32 4294967280, %v205_v22  ;;  %v326_v43 = vadd.s32 24, %v307_v42 }
  0x11   : > { %405 = vmatpush.xpose.msk.msra.mxu1 %vm250_vm2, %v248_v12  ;;  %v320_v44 = vadd.s32 16, %v307_v42  ;;  %v314_v60 = vadd.s32 8, %v307_v42 }
  0x12   : > { %v429_v11 = vpop.eup %428  ;;  %426 = vset.pattern.permute.xlu1 %v326_v43 }
  0x13   : > { %v189_v13 = vmul.f32 16.0, %v429_v11  ;;  %vm193_vm3 = vweird.f32 %v429_v11  ;;  %425 = vset.pattern.permute.xlu0 %v320_v44 }
  0x15   : > { %v190_v15 = vsub.f32 1.0, %v189_v13  ;;  %406 = vmatpush.xpose.msk.msra.mxu1 %vm250_vm2, %v247_v14 }
  0x17   : > { %v191_v16 = vmul.f32 %v429_v11, %v190_v15 }
  0x18   : > { %180 = vadd.xlane.f32.xlu0 %v179_v6  ;;  %186 = vadd.xlane.f32.xlu1 %v185_v7 }
  0x19   : > { %v192_v17 = vadd.f32 %v429_v11, %v191_v16  ;;  %407 = vmatpush.xpose.msk.msra.mxu1 %vm250_vm2, %v246_v39 }
  0x1b   : > { %v194_v21 = vsel %vm193_vm3, %v429_v11, %v192_v17 }
  0x83   : > { %v178_v19 = vpop.xlane.xlu0 %177  ;;  %v184_v20 = vpop.xlane.xlu1 %183 }
  0x84   : > { %v195_v23 = vmul.f32 %v194_v21, %v178_v19  ;;  %v197_v27 = vmul.f32 %v194_v21, %v184_v20 }
  0x86   : > { %v206_v32 = vperm.slane %v195_v23, %v205_v22  ;;  %v212_v35 = vperm.slane %v197_v27, %v211_v26 }
  0x8b   : > { %v181_v28 = vpop.xlane.xlu0 %180  ;;  %v187_v29 = vpop.xlane.xlu1 %186 }
  0x8c   : > { %v196_v30 = vmul.f32 %v194_v21, %v181_v28  ;;  %v198_v31 = vmul.f32 %v194_v21, %v187_v29 }
  0x8e   : > { %v208_v33 = vperm.slane %v196_v30, %v207_v24  ;;  %v216_v34 = vperm.slane %v198_v31, %v215_v25 }
  0x90   : > { %v210_v36 = vsel %vm209_vm4, %v208_v33, %v206_v32 }
  0x91   : > { %v214_v37 = vsel %vm213_vm5, %v212_v35, %v210_v36 }
  0x92   : > { %v218_v38 = vsel %vm217_vm6, %v216_v34, %v214_v37 }
  0x93   : > { %403 = vmatmul.msk.f32.vlgmr.msra.gmra.mxu0 %vm219_vm1, %v218_v38 }
 0x110   : > { %v242_v40 = vpop.f32.mrf.mxu0 }
 0x111   : > { %v245_v41 = vmax.f32 %v242_v40, 0.0 }
 0x113   : > { %408 = vmatmul.msk.f32.vlgmr.msra.gmra.mxu1 %vm250_vm2, %v245_v41 }
 0x190   : > { %v283_v45 = vpop.f32.mrf.mxu1 }
 0x191   : > { %v409_v46 = vmul.f32 -1.442695, %v283_v45 }
 0x193   : > { %430 = vpow2.f32 %v409_v46 }
 0x199   : > { %v431_v47 = vpop.eup %430 }
 0x19a   : > { %v289_v48 = vadd.f32 1.0, %v431_v47 }
 0x19c   : > { %432 = vrcp.f32 %v289_v48  ;;  %v301_v52 = vand.u32 2147483648, %v289_v48  ;;  %v299_v54 = vand.u32 2147483647, %v289_v48  ;;  %vm295_vm8 = vweird.f32 %v289_v48 }
 0x19e   : > { %v302_v56 = vor.u32 1.1754944e-38, %v301_v52  ;;  %vm300_vm10 = vcmp.eq.f32.partialorder %v299_v54, 8.507059e+37 }
 0x1a2   : > { %v433_v49 = vpop.eup %432 }
 0x1a3   : > { %v291_v50 = vmul.f32 %v433_v49, %v289_v48  ;;  %vm296_vm7 = vweird.f32 %v433_v49 }
 0x1a4   : > { %vm297_vm9 = vmor %vm295_vm8, %vm296_vm7 }
 0x1a5   : > { %v292_v51 = vsub.f32 1.0, %v291_v50 }
 0x1a7   : > { %v293_v53 = vmul.f32 %v433_v49, %v292_v51 }
 0x1a9   : > { %v294_v55 = vadd.f32 %v433_v49, %v293_v53 }
 0x1ab   : > { %v298_v57 = vsel %vm297_vm9, %v433_v49, %v294_v55 }
 0x1ac   : > { %v303_v58 = vsel %vm300_vm10, %v302_v56, %v298_v57 }
 0x1ad   : > { %v305_v59 = vperm.slane %v303_v58, 0 }
 0x1af   : > { %328 = vperm.xlu1 %426, %v305_v59   ;;  %322 = vperm.xlu0 %425, %v305_v59  }
 0x1b0   : > { %310 = vperm.xlu2 %423, %v305_v59  }
 0x1b7   : > { %427 = vset.pattern.permute.xlu0 %v326_v43 }
 0x1b8   : > { %424 = vset.pattern.permute.xlu2 %v314_v60 }
 0x1c0   : > { %316 = vperm.xlu2 %424, %v305_v59  }
 0x20a   : > { %v311_v61 = vpop.permute.xlu2 %310 }
 0x20b   : > { %v330_v62 = vmul.f32 %v311_v61, %v479_v0 }
 0x20d   : > { %334 = vst.msk [vmem:[%s170_s30] sm:$0xff] %vm175_vm0, %v330_v62 }
 0x21a   : > { %v317_v63 = vpop.permute.xlu2 %316 }
 0x21b   : > { %v331_v2 = vmul.f32 %v317_v63, %v487_v4 }
 0x21d   : > { %335 = vst.msk [vmem:[%s170_s30 + $0x8] sm:$0xff] %vm175_vm0, %v331_v2 }
 0x221   : > { %v329_v3 = vpop.permute.xlu1 %328  ;;  %v323_v6 = vpop.permute.xlu0 %322 }
 0x222   : > { %v333_v7 = vmul.f32 %v329_v3, %v489_v5  ;;  %v332_v8 = vmul.f32 %v323_v6, %v481_v1 }
 0x224   : > { %337 = vst.msk [vmem:[%s170_s30 + $0x18] sm:$0xff] %vm175_vm0, %v333_v7 }
 0x225   : > { %336 = vst.msk [vmem:[%s170_s30 + $0x10] sm:$0xff] %vm175_vm0, %v332_v8 }
 0x226 PF: > { %s13_s12 = sadd.s32 1, %s440_s12  }
 0x227   : > { %p10_p4 = scmp.ge.s32.totalorder %s13_s12, 4  }
 0x229   :  { %12 = sbr.rel (!%p10_p4) target bundleno = 1 (0x1), region = 62 }

</bundles_post_ra>
